<compile_context>
chip_gen: v7x
topology: tpu7x:2x2x1
jax: 0.10.0
libtpu: 0.0.40
codegen_flags: <defaults>
</compile_context>

<pallas_src>
import functools

import jax
import jax.numpy as jnp
from jax.experimental import pallas as pl
from jax.experimental.pallas import tpu as pltpu


# --------------------------------------------------------------------------
# Kernel 1: fused QKV projection   y = x @ [Wq|Wk|Wv] + [bq|bk|bv]
# --------------------------------------------------------------------------
def _qkv_proj_kernel(x_ref, w_ref, b_ref, qkv_ref):
    # x_ref: (1, TS, D) f32 ; w_ref: (D, 3D) bf16 ; b_ref: (1, 3D) f32
    x = x_ref[0].astype(jnp.bfloat16)
    acc = jnp.dot(x, w_ref[...], preferred_element_type=jnp.float32)
    qkv_ref[0] = (acc + b_ref[...]).astype(qkv_ref.dtype)


# --------------------------------------------------------------------------
# Kernel 2: batched-head attention + output projection (query-tiled)
# --------------------------------------------------------------------------
def _attn_kernel(q_ref, k_ref, v_ref, wo_ref, bo_ref, o_ref, *,
                 inv_scale, causal, q_tile):
    q = q_ref[0]                     # (H, TQ, d) bf16
    k = k_ref[0]                     # (H, S,  d) bf16
    v = v_ref[0]                     # (H, S,  d) bf16

    # scores = Q K^T / sqrt(d)  -- batched over heads, no explicit transpose.
    scores = jnp.einsum('hqd,hkd->hqk', q, k,
                        preferred_element_type=jnp.float32) * inv_scale

    if causal:
        TQ, S = q.shape[1], k.shape[1]
        q0 = pl.program_id(1) * q_tile
        row = q0 + jax.lax.broadcasted_iota(jnp.int32, (TQ, S), 0)
        col = jax.lax.broadcasted_iota(jnp.int32, (TQ, S), 1)
        scores = jnp.where((col > row)[None, :, :],
                           jnp.float32(-1e30), scores)

    # Numerically stable softmax in f32 over the key axis.
    m = jnp.max(scores, axis=-1, keepdims=True)
    e = jnp.exp(scores - m)
    p = e * pl.reciprocal(jnp.sum(e, axis=-1, keepdims=True), approx=True)

    # attention output per head (H, TQ, d), f32 accumulation.
    attn = jnp.einsum('hqk,hkd->hqd', p.astype(jnp.bfloat16), v,
                      preferred_element_type=jnp.float32)

    # Output projection, head-batched: sum_h attn_h @ Wo_h  (+ bias).
    proj = jnp.einsum('hqd,hdn->hqn', attn.astype(jnp.bfloat16), wo_ref[...],
                      preferred_element_type=jnp.float32)     # (H, TQ, D)
    out = jnp.sum(proj, axis=0) + bo_ref[...]                 # (TQ, D)
    o_ref[0] = out.astype(o_ref.dtype)


# --------------------------------------------------------------------------
# Wrapper
# --------------------------------------------------------------------------
def _seq_tile(S):
    """Largest convenient query/seq tile that divides S (multiple of 8)."""
    for t in (256, 128):
        if S % t == 0:
            return t
    return S  # small / odd sequence: one full-extent tile


def multi_head_self_attention(x, params, *, num_heads, causal=False):
    """x: (N, S, D) float32.  params: dict of PyTorch-convention weights."""
    N, S, D = x.shape
    if D % num_heads != 0:
        raise ValueError("input_dim must be divisible by num_heads")
    H = num_heads
    d = D // num_heads
    inv_scale = 1.0 / (float(d) ** 0.5)

    # Glue (plain XLA): torch.nn.Linear stores W as (out, in); pre-transpose,
    # fuse QKV, and cast weights to bf16 (halves weight DMA / VMEM footprint).
    wqkv = jnp.concatenate(
        [params["wq"].T, params["wk"].T, params["wv"].T], axis=1
    ).astype(jnp.bfloat16)                                         # (D, 3D)
    bqkv = jnp.concatenate(
        [params["bq"], params["bk"], params["bv"]]).reshape(1, 3 * D)
    wo_h = params["wo"].T.reshape(H, d, D).astype(jnp.bfloat16)    # (H, d, D)
    bo = params["bo"].reshape(1, D)

    TS = _seq_tile(S)
    qkv = pl.pallas_call(
        _qkv_proj_kernel,
        out_shape=jax.ShapeDtypeStruct((N, S, 3 * D), jnp.bfloat16),
        grid=(N, S // TS),
        in_specs=[
            pl.BlockSpec((1, TS, D), lambda n, s: (n, s, 0)),     # X tile
            pl.BlockSpec((D, 3 * D), lambda n, s: (0, 0)),        # fused W (const)
            pl.BlockSpec((1, 3 * D), lambda n, s: (0, 0)),        # fused bias
        ],
        out_specs=pl.BlockSpec((1, TS, 3 * D), lambda n, s: (n, s, 0)),
        compiler_params=pltpu.CompilerParams(
            dimension_semantics=("parallel", "parallel")),
    )(x, wqkv, bqkv)

    # Layout plumbing in the wrapper (not in-kernel): head-major Q/K/V so the
    # attention kernel consumes batched-head tiles with zero in-kernel
    # transposes or lane-axis head slicing.
    qkv = qkv.reshape(N, S, 3, H, d).transpose(2, 0, 3, 1, 4)      # (3,N,H,S,d)
    q, k, v = qkv[0], qkv[1], qkv[2]                               # (N,H,S,d)

    TQ = _seq_tile(S)
    kernel = functools.partial(_attn_kernel, inv_scale=inv_scale,
                               causal=causal, q_tile=TQ)

    return pl.pallas_call(
        kernel,
        out_shape=jax.ShapeDtypeStruct((N, S, D), x.dtype),
        grid=(N, S // TQ),
        in_specs=[
            pl.BlockSpec((1, H, TQ, d), lambda n, t: (n, 0, t, 0)),  # Q tile
            pl.BlockSpec((1, H, S, d), lambda n, t: (n, 0, 0, 0)),   # K (full)
            pl.BlockSpec((1, H, S, d), lambda n, t: (n, 0, 0, 0)),   # V (full)
            pl.BlockSpec((H, d, D), lambda n, t: (0, 0, 0)),         # Wo heads
            pl.BlockSpec((1, D), lambda n, t: (0, 0)),               # b_out
        ],
        out_specs=pl.BlockSpec((1, TQ, D), lambda n, t: (n, t, 0)),
        compiler_params=pltpu.CompilerParams(
            dimension_semantics=("parallel", "parallel")),
    )(q, k, v, wo_h, bo)


# --------------------------------------------------------------------------
# Pure-JAX f32 reference mirroring the PyTorch forward
# --------------------------------------------------------------------------
def _reference(x, params, *, num_heads, causal=False):
    N, S, D = x.shape
    d = D // num_heads
    scale = d ** 0.5

    def lin(x_, w, b):
        return x_ @ w.T + b

    q = lin(x, params["wq"], params["bq"]).reshape(N, S, num_heads, d).transpose(0, 2, 1, 3)
    k = lin(x, params["wk"], params["bk"]).reshape(N, S, num_heads, d).transpose(0, 2, 1, 3)
    v = lin(x, params["wv"], params["bv"]).reshape(N, S, num_heads, d).transpose(0, 2, 1, 3)

    scores = jnp.einsum("nhqd,nhkd->nhqk", q, k) / scale
    if causal:
        mask = jnp.triu(jnp.ones((S, S), dtype=bool), k=1)
        scores = jnp.where(mask[None, None], -jnp.inf, scores)
    w = jax.nn.softmax(scores, axis=-1)
    out = jnp.einsum("nhqk,nhkd->nhqd", w, v)
    out = out.transpose(0, 2, 1, 3).reshape(N, S, D)
    return lin(out, params["wo"], params["bo"])


if __name__ == "__main__":
    # Small shapes consistent with the module: batch=2, seq=8, hidden=32, heads=4.
    N, S, D, H = 2, 8, 32, 4

    key = jax.random.PRNGKey(0)
    keys = jax.random.split(key, 9)
    limit = 1.0 / (D ** 0.5)  # rough nn.Linear-style init scale, deterministic

    params = {
        "wq": jax.random.uniform(keys[0], (D, D), jnp.float32, -limit, limit),
        "bq": jax.random.uniform(keys[1], (D,), jnp.float32, -limit, limit),
        "wk": jax.random.uniform(keys[2], (D, D), jnp.float32, -limit, limit),
        "bk": jax.random.uniform(keys[3], (D,), jnp.float32, -limit, limit),
        "wv": jax.random.uniform(keys[4], (D, D), jnp.float32, -limit, limit),
        "bv": jax.random.uniform(keys[5], (D,), jnp.float32, -limit, limit),
        "wo": jax.random.uniform(keys[6], (D, D), jnp.float32, -limit, limit),
        "bo": jax.random.uniform(keys[7], (D,), jnp.float32, -limit, limit),
    }
    x = jax.random.normal(keys[8], (N, S, D), jnp.float32)

    # TODO(synk): optional runtime `attn_mask` argument not implemented
    # (module default is attn_mask=None); causal masking is supported via
    # the `causal` flag (module default mask=False).
    out = multi_head_self_attention(x, params, num_heads=H, causal=False)
    out = jax.block_until_ready(out)

    ref = _reference(x, params, num_heads=H, causal=False)
    assert out.shape == (N, S, D)
    # bf16 MXU operands (f32 accumulate / f32 softmax) => loosened tolerance.
    assert jnp.allclose(out, ref, atol=5e-2, rtol=5e-2), "mismatch vs reference"

    print("KERNEL_OK")
</pallas_src>

<mosaic_0001>
module attributes {stable_mosaic.version = 11 : i64} {
  func.func @_qkv_proj_kernel(%arg0: i32, %arg1: i32, %arg2: memref<1x8x32xf32, #tpu.memory_space<vmem>>, %arg3: memref<32x96xbf16, #tpu.memory_space<vmem>>, %arg4: memref<1x96xf32, #tpu.memory_space<vmem>>, %arg5: memref<1x8x96xbf16, #tpu.memory_space<vmem>>) attributes {dimension_semantics = [#tpu.dimension_semantics<parallel>, #tpu.dimension_semantics<parallel>], iteration_bounds = array<i64: 2, 1>, scalar_prefetch = 0 : i64, scratch_operands = 0 : i64, tpu.core_type = #tpu.core_type<tc>, window_params = [{transform_indices = @transform_0, window_bounds = array<i64: 1, 8, 32>}, {pipeline_mode = #tpu.pipeline_mode<synchronous>, transform_indices = @transform_1, window_bounds = array<i64: 32, 96>}, {pipeline_mode = #tpu.pipeline_mode<synchronous>, transform_indices = @transform_2, window_bounds = array<i64: 1, 96>}, {transform_indices = @transform_3, window_bounds = array<i64: 1, 8, 96>}]} {
    %c0 = arith.constant 0 : index
    %c0_0 = arith.constant 0 : index
    %c0_1 = arith.constant 0 : index
    %0 = vector.load %arg2[%c0, %c0_0, %c0_1] : memref<1x8x32xf32, #tpu.memory_space<vmem>>, vector<1x8x32xf32>
    %1 = vector.shape_cast %0 : vector<1x8x32xf32> to vector<8x32xf32>
    %2 = arith.truncf %1 : vector<8x32xf32> to vector<8x32xbf16>
    %c0_2 = arith.constant 0 : index
    %c0_3 = arith.constant 0 : index
    %3 = vector.load %arg3[%c0_2, %c0_3] : memref<32x96xbf16, #tpu.memory_space<vmem>>, vector<32x96xbf16>
    %cst = arith.constant dense<0.000000e+00> : vector<8x96xf32>
    %4 = tpu.matmul %2, %3, %cst {dimension_numbers = #tpu.dot_dimension_numbers<[1], [0], [0], [1], [0, 0, 1, 1], [], []>} : vector<8x32xbf16>, vector<32x96xbf16>, vector<8x96xf32> -> vector<8x96xf32>
    %c0_4 = arith.constant 0 : index
    %c0_5 = arith.constant 0 : index
    %5 = vector.load %arg4[%c0_4, %c0_5] : memref<1x96xf32, #tpu.memory_space<vmem>>, vector<1x96xf32>
    %6 = vector.broadcast %5 : vector<1x96xf32> to vector<8x96xf32>
    %7 = arith.addf %4, %6 : vector<8x96xf32>
    %8 = arith.truncf %7 : vector<8x96xf32> to vector<8x96xbf16>
    %c0_6 = arith.constant 0 : index
    %c0_7 = arith.constant 0 : index
    %c0_8 = arith.constant 0 : index
    %9 = vector.load %arg5[%c0_6, %c0_7, %c0_8] : memref<1x8x96xbf16, #tpu.memory_space<vmem>>, vector<1x8x96xbf16>
    %10 = vector.shape_cast %9 : vector<1x8x96xbf16> to vector<8x96xbf16>
    %11 = vector.shape_cast %8 : vector<8x96xbf16> to vector<1x8x96xbf16>
    tpu.vector_store %arg5[%c0_6, %c0_7, %c0_8], %11 {strides = array<i32>} : memref<1x8x96xbf16, #tpu.memory_space<vmem>>, vector<1x8x96xbf16>,
    return
  }
  func.func @transform_0(%arg0: i32, %arg1: i32) -> (i32, i32, i32) {
    %c0_i32 = arith.constant 0 : i32
    %c0_i32_0 = arith.constant 0 : i32
    return %arg0, %arg1, %c0_i32 : i32, i32, i32
  }
  func.func @transform_1(%arg0: i32, %arg1: i32) -> (i32, i32) {
    %c0_i32 = arith.constant 0 : i32
    %c0_i32_0 = arith.constant 0 : i32
    %c0_i32_1 = arith.constant 0 : i32
    return %c0_i32, %c0_i32_0 : i32, i32
  }
  func.func @transform_2(%arg0: i32, %arg1: i32) -> (i32, i32) {
    %c0_i32 = arith.constant 0 : i32
    %c0_i32_0 = arith.constant 0 : i32
    %c0_i32_1 = arith.constant 0 : i32
    return %c0_i32, %c0_i32_0 : i32, i32
  }
  func.func @transform_3(%arg0: i32, %arg1: i32) -> (i32, i32, i32) {
    %c0_i32 = arith.constant 0 : i32
    %c0_i32_0 = arith.constant 0 : i32
    return %arg0, %arg1, %c0_i32 : i32, i32, i32
  }
}

</mosaic_0001>

<bundles_post_ra>
// kernel: tpu_custom_call.1
= control target key start
LH: loop header
LB: loop body
LE: loop exit
PB: predicated region body
PF: predicated region fallthrough
CT: control target
= control target key end

     0   :  { %8 = vsyncpa [#allocation3], 0  ;;  %s896_s0 = inlined_call_operand.hbm [shape: f32[2,8,32], index: 0, kind: input, shape index: {}]   ;;  %s897_s1 = inlined_call_operand.hbm [shape: bf16[32,96], index: 1, kind: input, shape index: {}]   ;;  %s898_s2 = inlined_call_operand.vmem [shape: f32[1,96], index: 2, kind: input, shape index: {}]   ;;  %s899_s3 = inlined_call_operand.hbm [shape: bf16[2,8,96], index: 3, kind: output, shape index: {}]  }
   0x1   :  { %10 = vsyncpa [#allocation3 + $0x1], 0 }
   0x2   :  { %11 = vsyncpa [#allocation6], 0 }
   0x3   :  { %12 = vsyncpa [#allocation4], 0 }
   0x4   :  { %14 = vsyncpa [#allocation4 + $0x1], 0  ;;  %s678_s12 = smov 0   ;;  %s680_s13 = smov 0  }
   0x5   :  { %s682_s14 = smov 0   ;;  %s684_s15 = smov 0  }
   0x6   :  { %s686_s16 = smov 0   ;;  %s688_s17 = smov 0  }
   0x7 LB: > { %s396_s18 = sadd.s32 4294967295, %s649_s17   ;;  %s397_s19 = sadd.s32 4294967294, %s649_s17   ;;  %s649_s17 = sphi %s688_s17, %s20_s17   ;;  %s645_s16 = sphi %s686_s16, %s923_s16   ;;  %s641_s15 = sphi %s684_s15, %s922_s15   ;;  %s637_s14 = sphi %s682_s14, %s921_s14   ;;  %s633_s13 = sphi %s680_s13, %s920_s13   ;;  %s629_s12 = sphi %s678_s12, %s919_s12  }
   0x8   : > { %p54_p0 = scmp.ne.s32.totalorder %s633_s13, %s629_s12  ;;  %p712_p1 = scmp.eq.s32.totalorder %s396_s18, 0 }
   0x9   : > { %p716_p2 = scmp.eq.s32.totalorder %s396_s18, 1  ;;  %p128_p3 = scmp.eq.s32.totalorder %s397_s19, 1 }
   0xa   : > { %s904_s20 = scalar_select %p712_p1, 1, 0 }
   0xb   : > { %s905_s21 = scalar_select %p716_p2, 1, 0 }
   0xc   : > { %p722_p4 = por %p712_p1, %p54_p0  ;;  %p398_p5 = scmp.ge.s32.totalorder %s649_s17, 1 }
   0xd   : > { %p727_p6 = por %p128_p3, %p54_p0  ;;  %p135_p7 = scmp.lt.s32.totalorder %s649_s17, 3 }
   0xe   : > { %s906_s22 = scalar_select %p722_p4, 1, 0 }
   0xf   : > { %s907_s23 = scalar_select %p727_p6, 1, 0 }
  0x10   : > { %p732_p8 = pnand %p398_p5, %p135_p7  ;;  %s651_s25 = smov [#allocation5]  }
  0x11   : > { %s147_s26 = sshll.u32 %s651_s25, 4  ;;  %s32_s28 = sadd.s32 1, %s645_s16  ;;  %s148_s26 = int_to_ptr.vmem [resolvable:$true] %s147_s26 }
  0x12   : > { %s908_s24 = scalar_select %p732_p8, 1, 0 }
  0x13   : > { %p434_p9 = pneg %p732_p8  ;;  %s505_s4 = scalar_lea.hbm %s897_s1, 256 }
  0x14   : > { %p506_p12 = scmp.ne.s32.totalorder %s897_s1, %s505_s4  ;;  %p512_p5 = scmp.lt.u32.totalorder %s505_s4, %s897_s1 }
  0x15   : > { %p741_p11 = pnand %p434_p9, %p712_p1 }
  0x17   : > { %p507_p13 = pneg %p741_p11 }
  0x19   : > { %p508_p0 = pnand %p507_p13, %p506_p12 }
  0x1b   : > { %p509_p3 = pneg %p508_p0 }
  0x1d   : > { %p514_p7 = pnand %p512_p5, %p509_p3 }
  0x1f   : > { %517 = shalt.err (!%p514_p7)
}
  0x20   : > { %s518_s9 = scalar_lea.vmem %s148_s26, 256  ;;  %p526_p1 = scmp.lt.s32.totalorder %s148_s26, %s148_s26 }
  0x21   : > { %p519_p9 = scmp.ne.s32.totalorder %s148_s26, %s518_s9  ;;  %p527_p4 = scmp.lt.s32.totalorder %s518_s9, %s518_s9 }
  0x23   : > { %p521_p10 = pnand %p519_p9, %p507_p13  ;;  %p528_p8 = por %p527_p4, %p526_p1 }
  0x25   : > { %p522_p6 = pneg %p521_p10 }
  0x27   : > { %p529_p2 = pnand %p528_p8, %p522_p6 }
  0x29   : > { %532 = shalt.err (!%p529_p2)
}
  0x2a   : > { %s652_s10 = smov 64   ;;  %s653_s11 = smov 4  }
  0x2b   : > { %437 = dma.hbm_to_vmem [thread:$0]  (!%p741_p11), %s897_s1, 256, %s148_s26, [#allocation6], %s652_s10, %s652_s10, %s653_s11  }
  0x2c   : > { %p34_p1 = scmp.ge.s32.totalorder %s32_s28, 2  ;;  %s41_s25 = sadd.s32 1, %s637_s14 }
  0x2d   : > { %p48_p2 = scmp.ne.s32.totalorder %s637_s14, %s633_s13  ;;  %p49_p4 = scmp.eq.s32.totalorder %s649_s17, 0 }
  0x2e   : > { %s925_s28 = smov (%p34_p1, %s32_s28), 0  ;;  %p911_p8 = scmp.ne.s32.totalorder %s905_s21, 0 }
  0x2f   : > { %p768_p6 = por %p49_p4, %p48_p2  ;;  %s36_s27 = ssub.s32 %s645_s16, %s925_s28 }
  0x30   : > { %p774_p10 = por %p911_p8, %p48_p2  ;;  %p447_p12 = scmp.lt.s32.totalorder %s649_s17, 2 }
  0x31   : > { %p39_p11 = scmp.eq.s32.totalorder %s36_s27, 0  ;;  %s164_s26 = sand.u32 1, %s637_s14  }
  0x32   : > { %s401_s4 = sshll.u32 %s164_s26, 3  ;;  %s402_s6 = sshll.u32 %s645_s16, 7 }
  0x33   : > { %s783_s5 = scalar_select %p39_p11, %s637_s14, %s41_s25  }
  0x34   : > { %s789_s9 = scalar_lea.hbm %s896_s0, %s402_s6  ;;  %s168_s21 = scalar_lea.vmem [#allocation2], %s401_s4 }
  0x35   : > { %s176_s10 = sshll.u32 %s168_s21, 4  ;;  %p795_p13 = pnand %p447_p12, %p768_p6  ;;  %s791_s10 = int_to_ptr.vmem [resolvable:$true] %s176_s10 }
  0x36   : > { %s165_s18 = scalar_lea.sflag [#allocation3], %s164_s26  ;;  %s533_s19 = scalar_lea.hbm %s789_s9, 128 }
  0x37   : > { %p534_p0 = scmp.ne.s32.totalorder %s789_s9, %s533_s19  ;;  %p535_p3 = pneg %p795_p13 }
  0x38   : > { %s538_s4 = scalar_lea.hbm %s896_s0, 256  ;;  %p539_p9 = scmp.lt.u32.totalorder %s789_s9, %s896_s0 }
  0x39   : > { %p536_p5 = pnand %p535_p3, %p534_p0  ;;  %p540_p1 = scmp.lt.u32.totalorder %s538_s4, %s533_s19 }
  0x3a   : > { %p542_p4 = scmp.lt.u32.totalorder %s533_s19, %s789_s9 }
  0x3b   : > { %p537_p7 = pneg %p536_p5  ;;  %p541_p2 = por %p540_p1, %p539_p9 }
  0x3d   : > { %p543_p6 = por %p542_p4, %p541_p2 }
  0x3f   : > { %p544_p8 = pnand %p543_p6, %p537_p7 }
  0x41   : > { %547 = shalt.err (!%p544_p8)
}
  0x42   : > { %s548_s26 = scalar_lea.vmem %s791_s10, 128  ;;  %s654_s7 = smov [#allocation2]  }
  0x43   : > { %p549_p12 = scmp.ne.s32.totalorder %s791_s10, %s548_s26  ;;  %s553_s8 = sshll.u32 %s654_s7, 4  ;;  %s554_s8 = int_to_ptr.vmem [resolvable:$false] %s553_s8 }
  0x44   : > { %s555_s21 = scalar_lea.vmem %s554_s8, 256  ;;  %p556_p5 = scmp.lt.s32.totalorder %s791_s10, %s554_s8 }
  0x45   : > { %p551_p11 = pnand %p549_p12, %p535_p3  ;;  %p557_p9 = scmp.lt.s32.totalorder %s555_s21, %s548_s26 }
  0x47   : > { %p552_p0 = pneg %p551_p11  ;;  %p558_p1 = por %p557_p9, %p556_p5 }
  0x49   : > { %p559_p2 = pnand %p558_p1, %p552_p0 }
  0x4b   : > { %562 = shalt.err (!%p559_p2)
}
  0x4c   : > { %441 = dma.hbm_to_vmem [thread:$0]  (!%p795_p13), %s789_s9, 128, %s791_s10, %s165_s18  }
  0x4d   : > { %p914_p7 = scmp.ne.s32.totalorder %s908_s24, 0 }
  0x4e   : > { %s827_s19 = sand.u32 (!%p914_p7), 1, %s633_s13   ;;  %p915_p3 = scmp.ne.s32.totalorder (!%p914_p7), %s906_s22, 0 }
  0x4f   : > { %185 = sbr.rel (%p914_p7) target bundleno = 329 (0x149), region = 32  ;;  %s404_s25 = sshll.u32 (!%p914_p7), %s827_s19, 3 }
  0x50   : > { %s188_s27 = scalar_lea.sflag (!%p914_p7), [#allocation3], %s827_s19  ;;  %s191_s4 = scalar_lea.vmem (!%p914_p7), [#allocation2], %s404_s25 }
  0x56   : > { %616 = dma.done.wait (%p915_p3), %s188_s27, 128  }
  0x57   : > { %618 = vsyncadd (%p915_p3), %s188_s27, 4294967168  ;;  %p916_p4 = scmp.ne.s32.totalorder %s904_s20, 0 }
  0x59   : > { %620 = dma.done.wait (%p916_p4), [#allocation6], 256  }
  0x5a   : > { %622 = vsyncadd (%p916_p4), [#allocation6], 4294967040  ;;  %v655_v0 = vmov 0.0   ;;  %vm656_vm0 = vmmov 0   ;;  %v503_v1 = vld [vmem:[#allocation5] sm:$0xff]   ;;  %v504_v2 = vld [vmem:[#allocation5 + $0x8] sm:$0xff]  }
  0x5b   : > { %418 = vmatprep.subr.bf16.mxu0 %v655_v0  ;;  %422 = vmatprep.mubr.msk.bf16.mxu0 %vm656_vm0, %v655_v0  ;;  %v219_v3 = vld [vmem:[%s191_s4] sm:$0xff]  ;;  %vm244_vm1 = vcmask 261120   ;;  %s406_s22 = sshll.u32 %s827_s19, 2  ;;  %s412_s9 = sshll.u32 %s641_s15, 6  ;;  %vm289_vm2 = vcmask 781312  }
  0x5c   : > { %419 = vmatpush3.bf16.msra.mxu0 %v503_v1  ;;  %v220_v4 = vpack.c.bf16 %v219_v3, %v219_v3  ;;  %v407_v5 = vld [vmem:[%s898_s2] ss:$0 sm:$0xff]  ;;  %s217_s10 = scalar_lea.vmem [#allocation7], %s406_s22  ;;  %s847_s6 = scalar_lea.hbm %s899_s3, %s412_s9 }
  0x5d   : > { %420 = vmatprep.subr.bf16.mxu0 %v655_v0  ;;  %s306_s11 = sshll.u32 %s217_s10, 4  ;;  %s292_s15 = scalar_lea.sflag [#allocation4], %s827_s19  ;;  %s849_s11 = int_to_ptr.vmem [resolvable:$true] %s306_s11 }
  0x5e   : > { %s563_s26 = scalar_lea.vmem %s849_s11, 64  ;;  %s657_s7 = smov [#allocation7]  }
  0x5f   : > { %p564_p13 = scmp.ne.s32.totalorder %s849_s11, %s563_s26  ;;  %s567_s8 = sshll.u32 %s657_s7, 4  ;;  %s568_s8 = int_to_ptr.vmem [resolvable:$false] %s567_s8 }
  0x60   : > { %421 = vmatpush3.bf16.msra.mxu0 %v504_v2  ;;  %s569_s21 = scalar_lea.vmem %s568_s8, 128  ;;  %p570_p12 = scmp.lt.s32.totalorder %s849_s11, %s568_s8 }
  0x61   : > { %p565_p6 = pnand %p564_p13, %p774_p10  ;;  %p571_p11 = scmp.lt.s32.totalorder %s569_s21, %s563_s26 }
  0x63   : > { %423 = vmatmul.mubr.msk.bf16.vlgmr.msra.gmra.mrb[0].mxu0 %vm244_vm1, %v220_v4  ;;  %p566_p8 = pneg %p565_p6  ;;  %p572_p0 = por %p571_p11, %p570_p12 }
  0x65   : > { %p573_p5 = pnand %p572_p0, %p566_p8 }
 0x136   : > { %v282_v6 = vpop.f32.mrb[0].mxu0 }
 0x137   : > { %v283_v7 = vadd.f32 %v407_v5, %v282_v6  ;;  %v424_v8 = vpop.f32.mrb[1].mxu0 }
 0x138   : > { %v285_v9 = vpop.f32.mrb[2].mxu0 }
 0x139   : > { %v288_v10 = vpack.c.bf16 %v283_v7, %v283_v7  ;;  %v425_v11 = vpop.f32.mrb[3].mxu0 }
 0x13b   : > { %290 = vst.msk [vmem:[%s217_s10] sm:$0xf] %vm289_vm2, %v288_v10 }
 0x13c   : > { %576 = shalt.err (!%p573_p5)
}
 0x13d   : > { %s577_s19 = scalar_lea.hbm %s847_s6, 64  ;;  %s581_s4 = scalar_lea.hbm %s899_s3, 128 }
 0x13e   : > { %p578_p9 = scmp.ne.s32.totalorder %s847_s6, %s577_s19  ;;  %p582_p7 = scmp.lt.u32.totalorder %s847_s6, %s899_s3 }
 0x13f   : > { %p583_p3 = scmp.lt.u32.totalorder %s581_s4, %s577_s19  ;;  %p585_p13 = scmp.lt.u32.totalorder %s577_s19, %s847_s6 }
 0x140   : > { %p579_p1 = pnand %p578_p9, %p774_p10 }
 0x141   : > { %p584_p4 = por %p583_p3, %p582_p7 }
 0x142   : > { %p580_p2 = pneg %p579_p1 }
 0x143   : > { %p586_p6 = por %p585_p13, %p584_p4 }
 0x145   : > { %p587_p8 = pnand %p586_p6, %p580_p2 }
 0x147   : > { %590 = shalt.err (!%p587_p8)
}
 0x148   : > { %432 = dma.vmem_to_hbm [thread:$0]  (%p774_p10), %s849_s11, 64, %s847_s6, %s292_s15  }
 0x149 PF: > { %s318_s20 = sand.u32 1, %s629_s12   ;;  %p917_p12 = scmp.ne.s32.totalorder %s907_s23, 0 }
 0x14a   : > { %p918_p11 = scmp.ge.s32.totalorder %s649_s17, 2  ;;  %s319_s9 = scalar_lea.sflag [#allocation4], %s318_s20 }
 0x14c   : > { %p443_p0 = pnand %p918_p11, %p917_p12 }
 0x14e   : > { %624 = dma.done.wait (!%p443_p0), %s319_s9, 64  }
 0x14f   : > { %626 = vsyncadd (!%p443_p0), %s319_s9, 4294967232  ;;  %s20_s17 = sadd.s32 1, %s649_s17   ;;  %s919_s12 = smov %s633_s13 }
 0x150   : > { %p17_p5 = scmp.ge.s32.totalorder %s20_s17, 4   ;;  %s920_s13 = smov %s637_s14 }
 0x151   : > { %s921_s14 = smov %s783_s5  ;;  %s922_s15 = smov %s645_s16 }
 0x152   : > { %s923_s16 = smov %s925_s28  ;;  %19 = sbr.rel (!%p17_p5) target bundleno = 7 (0x7), region = 81 }
 0x159   :  { %324 = vsyncpa [#allocation3], 1 }
 0x15a   :  { %326 = vsyncpa [#allocation3 + $0x1], 1 }
 0x15b   :  { %327 = vsyncpa [#allocation6], 1 }
 0x15c   :  { %328 = vsyncpa [#allocation4], 1 }
 0x15d   :  { %330 = vsyncpa [#allocation4 + $0x1], 1 }

</bundles_post_ra>
